<compile_context>
chip_gen: v6e
topology: v6e:2x2x1
jax: 0.10.0
libtpu: 0.0.40
codegen_flags: <defaults>
</compile_context>

<pallas_src>
import math

import numpy as np
import jax
import jax.numpy as jnp
from jax.experimental import pallas as pl
from jax.experimental.pallas import tpu as pltpu


# ----------------------------------------------------------------------------
# Tile pickers (respect Mosaic's (8, 128) block constraints, prefer >=2 tiles
# so both TensorCores get work on v7x).
# ----------------------------------------------------------------------------
def _pick_row_tile(n_rows, target=256):
    cands = [m for m in range(8, min(n_rows, target) + 1, 8) if n_rows % m == 0]
    multi = [m for m in cands if n_rows // m >= 2]
    if multi:
        return max(multi)
    if cands:
        return max(cands)
    return n_rows


def _pick_lane_tile(n_cols, seq_len, target=512):
    # Lane tile for the (C, B*T) TCN layout: multiple of 128 (lane tiling) and of
    # seq_len (sample segments), dividing n_cols; otherwise take the whole axis.
    q = (128 * seq_len) // math.gcd(128, seq_len)
    cands = [m for m in range(q, min(n_cols, target) + 1, q) if n_cols % m == 0]
    multi = [m for m in cands if n_cols // m >= 2]
    if multi:
        return max(multi)
    if cands:
        return max(cands)
    return n_cols


# ----------------------------------------------------------------------------
# Kernel 1: fused InputBlock (spatial convs + MaxPool + 2-layer MLP head).
# Row-tiled over N = B*T; every matmul has M = row-tile (sample axis folded into M).
# ----------------------------------------------------------------------------
def make_input_block_kernel(layer_halves, n_s, n_p):
    def kernel(x_ref, *refs):
        o_ref = refs[-1]
        refs = refs[:-1]
        x = x_ref[...]                                           # (R, F)
        idx = 0
        if n_p > 0:
            h = x[:, n_s:] if n_s > 0 else x                     # flattened profiles
            for half in layer_halves:
                m_ref, brow_ref = refs[idx], refs[idx + 1]
                idx += 2
                # Conv1d(valid) + bias + ReLU as one MXU matmul (weights pre-folded)
                y = jnp.dot(h, m_ref[...],
                            preferred_element_type=jnp.float32) + brow_ref[...]
                y = jnp.maximum(y, 0.0)
                # MaxPool1d(2): pure VPU max of the two contiguous column halves
                h = jnp.maximum(y[:, :half], y[:, half:])
            w1p_ref = refs[idx]
            idx += 1
            z = jnp.dot(h, w1p_ref[...], preferred_element_type=jnp.float32)
            if n_s > 0:
                w1s_ref = refs[idx]
                idx += 1
                # torch.cat([scalars, conv_features]) @ W1  ==  split matmuls (no concat)
                z = z + jnp.dot(x[:, :n_s], w1s_ref[...],
                                preferred_element_type=jnp.float32)
        else:
            w1_ref = refs[idx]
            idx += 1
            z = jnp.dot(x, w1_ref[...], preferred_element_type=jnp.float32)
        b1_ref, w2_ref, b2_ref = refs[idx], refs[idx + 1], refs[idx + 2]
        z = jnp.maximum(z + b1_ref[...], 0.0)                    # Linear -> ReLU
        z = jnp.maximum(jnp.dot(z, w2_ref[...],
                                preferred_element_type=jnp.float32) + b2_ref[...], 0.0)
        o_ref[...] = z                                           # (R, linear_size)
    return kernel


def input_block_forward(x_flat, kp, cfg):
    n_s, n_p = cfg["n_scalars"], cfg["n_profiles"]
    N, F = x_flat.shape
    H = cfg["linear_size"]
    R = _pick_row_tile(N)

    args = [x_flat]
    in_specs = [pl.BlockSpec((R, F), lambda g: (g, 0))]
    layer_halves = []
    if n_p > 0:
        for (m, brow) in kp["conv_layers"]:
            args += [m, brow]
            in_specs += [pl.BlockSpec(m.shape, lambda g: (0, 0)),
                         pl.BlockSpec(brow.shape, lambda g: (0, 0))]
            layer_halves.append(brow.shape[1] // 2)
        args.append(kp["w1p"])
        in_specs.append(pl.BlockSpec(kp["w1p"].shape, lambda g: (0, 0)))
        if n_s > 0:
            args.append(kp["w1s"])
            in_specs.append(pl.BlockSpec(kp["w1s"].shape, lambda g: (0, 0)))
    else:
        args.append(kp["w1_full"])
        in_specs.append(pl.BlockSpec(kp["w1_full"].shape, lambda g: (0, 0)))
    args += [kp["b1"], kp["w2"], kp["b2"]]
    in_specs += [pl.BlockSpec(kp["b1"].shape, lambda g: (0, 0)),
                 pl.BlockSpec(kp["w2"].shape, lambda g: (0, 0)),
                 pl.BlockSpec(kp["b2"].shape, lambda g: (0, 0))]

    return pl.pallas_call(
        make_input_block_kernel(layer_halves, n_s, n_p),
        out_shape=jax.ShapeDtypeStruct((N, H), jnp.float32),
        grid=(N // R,),
        in_specs=in_specs,
        out_specs=pl.BlockSpec((R, H), lambda g: (g, 0)),
        compiler_params=pltpu.CompilerParams(dimension_semantics=("parallel",)),
    )(*args)


# ----------------------------------------------------------------------------
# Kernel 2: fused TCN (all TemporalBlocks) + final Linear, channels-first (C, B*T).
# ----------------------------------------------------------------------------
def _causal_shift(v, s, seq_len):
    # Shift columns (time) right by s with zero fill, per length-seq_len segment
    # (lanes are the flattened (batch, time) axis).
    if s == 0:
        return v
    if s >= seq_len:
        return jnp.zeros_like(v)
    c, r = v.shape
    shifted = jnp.concatenate([jnp.zeros((c, s), v.dtype), v[:, :r - s]], axis=1)
    if r > seq_len:                       # >1 sample per tile: mask cross-sample leakage
        t = jax.lax.broadcasted_iota(jnp.int32, (c, r), 1) % seq_len
        shifted = jnp.where(t >= s, shifted, 0.0)
    return shifted


def _dilated_causal_conv(a, w_ref, b_ref, k_size, dilation, seq_len):
    # PyTorch Conv1d(padding=(K-1)*d, dilation=d) + Chomp1d((K-1)*d) + ReLU:
    # out[:, t] = sum_k W_k @ x[:, t - (K-1-k)*d]  (zero where the index is negative).
    acc = _causal_shift(
        jnp.dot(w_ref[0], a, preferred_element_type=jnp.float32),
        (k_size - 1) * dilation, seq_len)
    for k in range(1, k_size):
        acc = acc + _causal_shift(
            jnp.dot(w_ref[k], a, preferred_element_type=jnp.float32),
            (k_size - 1 - k) * dilation, seq_len)
    return jnp.maximum(acc + b_ref[...], 0.0)


def make_tcn_kernel(block_meta, k_size, seq_len):
    def kernel(z_ref, *refs):
        o_ref = refs[-1]
        refs = refs[:-1]
        a = z_ref[...]                                           # (C0, tile_cols)
        idx = 0
        for meta in block_meta:
            w1_ref, b1_ref, w2_ref, b2_ref = refs[idx:idx + 4]
            idx += 4
            h = _dilated_causal_conv(a, w1_ref, b1_ref, k_size, meta["dilation"], seq_len)
            h = _dilated_causal_conv(h, w2_ref, b2_ref, k_size, meta["dilation"], seq_len)
            if meta["has_ds"]:
                wd_ref, bd_ref = refs[idx], refs[idx + 1]
                idx += 2
                res = jnp.dot(wd_ref[...], a,
                              preferred_element_type=jnp.float32) + bd_ref[...]
            else:
                res = a
            a = jnp.maximum(h + res, 0.0)                        # residual + ReLU
        wo_ref, bo_ref = refs[idx], refs[idx + 1]
        # final Linear, written lane-dense as (output_size, tile_cols)
        o_ref[...] = jnp.dot(wo_ref[...], a,
                             preferred_element_type=jnp.float32) + bo_ref[...]
    return kernel


def tcn_forward(z, kp, cfg, B, T):
    N, H = z.shape
    K_t = cfg["kernel_size_temporal"]
    zt = z.T                                  # (H, B*T): mirrors the module's transpose(1, 2)
    R = _pick_lane_tile(N, T)

    args = [zt]
    in_specs = [pl.BlockSpec((H, R), lambda g: (0, g))]
    block_meta = []
    for i, blk in enumerate(kp["tcn_blocks"]):
        args += [blk["w1"], blk["b1"], blk["w2"], blk["b2"]]
        in_specs += [pl.BlockSpec(blk["w1"].shape, lambda g: (0, 0, 0)),
                     pl.BlockSpec(blk["b1"].shape, lambda g: (0, 0)),
                     pl.BlockSpec(blk["w2"].shape, lambda g: (0, 0, 0)),
                     pl.BlockSpec(blk["b2"].shape, lambda g: (0, 0))]
        has_ds = "wd" in blk
        if has_ds:
            args += [blk["wd"], blk["bd"]]
            in_specs += [pl.BlockSpec(blk["wd"].shape, lambda g: (0, 0)),
                         pl.BlockSpec(blk["bd"].shape, lambda g: (0, 0))]
        block_meta.append({"dilation": 2 ** i, "has_ds": has_ds})
    wo, bo = kp["tcn_lin"]
    args += [wo, bo]
    in_specs += [pl.BlockSpec(wo.shape, lambda g: (0, 0)),
                 pl.BlockSpec(bo.shape, lambda g: (0, 0))]
    n_out = wo.shape[0]

    out = pl.pallas_call(
        make_tcn_kernel(block_meta, K_t, T),
        out_shape=jax.ShapeDtypeStruct((n_out, N), jnp.float32),
        grid=(N // R,),
        in_specs=in_specs,
        out_specs=pl.BlockSpec((n_out, R), lambda g: (0, g)),
        compiler_params=pltpu.CompilerParams(dimension_semantics=("parallel",)),
    )(*args)
    return out.reshape(n_out, B, T).transpose(1, 2, 0)           # (B, T, output_size)


# ----------------------------------------------------------------------------
# Parameters: synthetic init (PyTorch-like layouts) + host-side weight folding.
# ----------------------------------------------------------------------------
def calculate_conv_output_size(L_in, padding, dilation, stride, kernel_size):
    return int(np.floor((L_in + 2 * padding - dilation * (kernel_size - 1) - 1) / stride + 1))


def init_ftcn_params(key, cfg):
    keys = jax.random.split(key, 64)
    kit = iter(keys)

    def nrm(shape, scale=0.1):
        return scale * jax.random.normal(next(kit), shape, dtype=jnp.float32)

    n_s, n_p, L = cfg["n_scalars"], cfg["n_profiles"], cfg["profile_size"]
    K_sp, K_t = cfg["kernel_size_spatial"], cfg["kernel_size_temporal"]
    H = cfg["linear_size"]

    params = {"spatial": []}
    L_cur, c_in = L, n_p
    conv_out = 0
    if n_p > 0:
        for c_out in cfg["layer_sizes_spatial"]:
            params["spatial"].append((nrm((c_out, c_in, K_sp)), nrm((c_out,))))
            L_cur = calculate_conv_output_size(L_cur, 0, 1, 1, K_sp)
            L_cur = calculate_conv_output_size(L_cur, 0, 1, 2, 2)
            c_in = c_out
        conv_out = c_in * L_cur
    feat = n_s + conv_out
    params["lin1"] = (nrm((feat, H)), nrm((1, H)))     # stored (in, out) for right-matmul
    params["lin2"] = (nrm((H, H)), nrm((1, H)))

    blocks = []
    c_prev = H
    for c in cfg["num_channels_tcn"]:
        blk = {"w1": nrm((K_t, c, c_prev), 0.01), "b1": nrm((c, 1), 0.01),
               "w2": nrm((K_t, c, c), 0.01), "b2": nrm((c, 1), 0.01)}
        if c_prev != c:
            blk["wd"] = nrm((c, c_prev), 0.01)
            blk["bd"] = nrm((c, 1), 0.01)
        blocks.append(blk)
        c_prev = c
    params["tcn_blocks"] = blocks
    params["tcn_lin"] = (nrm((cfg["output_size"], c_prev)), nrm((cfg["output_size"], 1)))
    return params


def _fold_conv_pool(w, b, c_in, l_in, k_size):
    """Fold valid Conv1d (PyTorch weight (C_out, C_in, K)) + bias + MaxPool1d(2) into a
    single (C_in*L_in, 2*C_out*L_pool) matmul.  Output columns are ordered
    [even pooled positions | odd pooled positions], channel-major within each half, so
    pooling is an elementwise max of the two halves and the pooled features keep
    PyTorch's channel-major flattening order."""
    c_out = w.shape[0]
    l_out = l_in - k_size + 1
    l_pool = l_out // 2
    half = c_out * l_pool
    m = np.zeros((c_in * l_in, 2 * half), np.float32)
    brow = np.zeros((1, 2 * half), np.float32)
    for o in range(c_out):
        for p in range(l_pool):
            for parity in (0, 1):
                col = parity * half + o * l_pool + p
                t = 2 * p + parity
                brow[0, col] = b[o]
                for i in range(c_in):
                    for kk in range(k_size):
                        m[i * l_in + t + kk, col] = w[o, i, kk]
    return m, brow, c_out, l_pool


def build_kernel_params(params, cfg):
    """Host-side weight folding (done once, outside jit)."""
    n_s, n_p, L = cfg["n_scalars"], cfg["n_profiles"], cfg["profile_size"]
    K_sp = cfg["kernel_size_spatial"]
    kp = {"tcn_blocks": params["tcn_blocks"], "tcn_lin": params["tcn_lin"],
          "b1": params["lin1"][1], "w2": params["lin2"][0], "b2": params["lin2"][1]}
    conv_layers = []
    c_in, l_in = n_p, L
    for (w, b) in params["spatial"]:
        m, brow, c_in, l_in = _fold_conv_pool(np.asarray(w), np.asarray(b), c_in, l_in, K_sp)
        conv_layers.append((jnp.asarray(m), jnp.asarray(brow)))
    kp["conv_layers"] = conv_layers
    w1 = params["lin1"][0]
    if n_p > 0:
        kp["w1p"] = w1[n_s:, :] if n_s > 0 else w1
        kp["w1s"] = w1[:n_s, :] if n_s > 0 else None
    else:
        kp["w1_full"] = w1
    return kp


# ----------------------------------------------------------------------------
# Full forward.
# ----------------------------------------------------------------------------
def ftcn_forward(x, kparams, cfg):
    B, T, F = x.shape
    x_flat = x.reshape(B * T, F)                     # TimeDistributed: fold time into batch
    z = input_block_forward(x_flat, kparams, cfg)    # (B*T, linear_size)
    return tcn_forward(z, kparams, cfg, B, T)        # (B, T, output_size)


if __name__ == "__main__":
    cfg = dict(
        n_scalars=2,
        n_profiles=4,
        profile_size=16,
        layer_sizes_spatial=[4, 8],
        kernel_size_spatial=3,
        linear_size=32,
        output_size=1,
        num_channels_tcn=[16, 16],
        kernel_size_temporal=2,
    )
    B, T = 2, 8
    F = cfg["n_scalars"] + cfg["n_profiles"] * cfg["profile_size"]   # 66

    key = jax.random.PRNGKey(0)
    kx, kpar = jax.random.split(key)
    x = jax.random.normal(kx, (B, T, F), dtype=jnp.float32)
    raw_params = init_ftcn_params(kpar, cfg)
    kparams = build_kernel_params(raw_params, cfg)

    y = ftcn_forward(x, kparams, cfg)
    y = jax.block_until_ready(y)
    assert y.shape == (B, T, cfg["output_size"])
    assert bool(jnp.all(jnp.isfinite(y)))
    print("KERNEL_OK")
</pallas_src>

<mosaic_0001>
module attributes {stable_mosaic.version = 11 : i64} {
  func.func @kernel(%arg0: i32, %arg1: memref<8x66xf32, #tpu.memory_space<vmem>>, %arg2: memref<64x56xf32, #tpu.memory_space<vmem>>, %arg3: memref<1x56xf32, #tpu.memory_space<vmem>>, %arg4: memref<28x32xf32, #tpu.memory_space<vmem>>, %arg5: memref<1x32xf32, #tpu.memory_space<vmem>>, %arg6: memref<16x32xf32, #tpu.memory_space<vmem>>, %arg7: memref<2x32xf32, #tpu.memory_space<vmem>>, %arg8: memref<1x32xf32, #tpu.memory_space<vmem>>, %arg9: memref<32x32xf32, #tpu.memory_space<vmem>>, %arg10: memref<1x32xf32, #tpu.memory_space<vmem>>, %arg11: memref<8x32xf32, #tpu.memory_space<vmem>>) attributes {dimension_semantics = [#tpu.dimension_semantics<parallel>], iteration_bounds = array<i64: 2>, scalar_prefetch = 0 : i64, scratch_operands = 0 : i64, tpu.core_type = #tpu.core_type<tc>, window_params = [{transform_indices = @transform_0, window_bounds = array<i64: 8, 66>}, {pipeline_mode = #tpu.pipeline_mode<synchronous>, transform_indices = @transform_1, window_bounds = array<i64: 64, 56>}, {pipeline_mode = #tpu.pipeline_mode<synchronous>, transform_indices = @transform_2, window_bounds = array<i64: 1, 56>}, {pipeline_mode = #tpu.pipeline_mode<synchronous>, transform_indices = @transform_3, window_bounds = array<i64: 28, 32>}, {pipeline_mode = #tpu.pipeline_mode<synchronous>, transform_indices = @transform_4, window_bounds = array<i64: 1, 32>}, {pipeline_mode = #tpu.pipeline_mode<synchronous>, transform_indices = @transform_5, window_bounds = array<i64: 16, 32>}, {pipeline_mode = #tpu.pipeline_mode<synchronous>, transform_indices = @transform_6, window_bounds = array<i64: 2, 32>}, {pipeline_mode = #tpu.pipeline_mode<synchronous>, transform_indices = @transform_7, window_bounds = array<i64: 1, 32>}, {pipeline_mode = #tpu.pipeline_mode<synchronous>, transform_indices = @transform_8, window_bounds = array<i64: 32, 32>}, {pipeline_mode = #tpu.pipeline_mode<synchronous>, transform_indices = @transform_9, window_bounds = array<i64: 1, 32>}, {transform_indices = @transform_10, window_bounds = array<i64: 8, 32>}]} {
    %c0 = arith.constant 0 : index
    %c0_0 = arith.constant 0 : index
    %0 = vector.load %arg1[%c0, %c0_0] : memref<8x66xf32, #tpu.memory_space<vmem>>, vector<8x66xf32>
    %1 = vector.extract_strided_slice %0 {offsets = [0, 2], sizes = [8, 64], strides = [1, 1]} : vector<8x66xf32> to vector<8x64xf32>
    %c0_1 = arith.constant 0 : index
    %c0_2 = arith.constant 0 : index
    %2 = vector.load %arg2[%c0_1, %c0_2] : memref<64x56xf32, #tpu.memory_space<vmem>>, vector<64x56xf32>
    %cst = arith.constant dense<0.000000e+00> : vector<8x56xf32>
    %3 = tpu.matmul %1, %2, %cst {dimension_numbers = #tpu.dot_dimension_numbers<[1], [0], [0], [1], [0, 0, 1, 1], [], []>} : vector<8x64xf32>, vector<64x56xf32>, vector<8x56xf32> -> vector<8x56xf32>
    %c0_3 = arith.constant 0 : index
    %c0_4 = arith.constant 0 : index
    %4 = vector.load %arg3[%c0_3, %c0_4] : memref<1x56xf32, #tpu.memory_space<vmem>>, vector<1x56xf32>
    %5 = vector.broadcast %4 : vector<1x56xf32> to vector<8x56xf32>
    %6 = arith.addf %3, %5 : vector<8x56xf32>
    %cst_5 = arith.constant 0.000000e+00 : f32
    %7 = vector.broadcast %cst_5 : f32 to vector<8x56xf32>
    %8 = arith.maximumf %6, %7 : vector<8x56xf32>
    %9 = vector.extract_strided_slice %8 {offsets = [0, 0], sizes = [8, 28], strides = [1, 1]} : vector<8x56xf32> to vector<8x28xf32>
    %10 = vector.extract_strided_slice %8 {offsets = [0, 28], sizes = [8, 28], strides = [1, 1]} : vector<8x56xf32> to vector<8x28xf32>
    %11 = arith.maximumf %9, %10 : vector<8x28xf32>
    %c0_6 = arith.constant 0 : index
    %c0_7 = arith.constant 0 : index
    %12 = vector.load %arg4[%c0_6, %c0_7] : memref<28x32xf32, #tpu.memory_space<vmem>>, vector<28x32xf32>
    %cst_8 = arith.constant dense<0.000000e+00> : vector<8x32xf32>
    %13 = tpu.matmul %11, %12, %cst_8 {dimension_numbers = #tpu.dot_dimension_numbers<[1], [0], [0], [1], [0, 0, 1, 1], [], []>} : vector<8x28xf32>, vector<28x32xf32>, vector<8x32xf32> -> vector<8x32xf32>
    %c0_9 = arith.constant 0 : index
    %c0_10 = arith.constant 0 : index
    %14 = vector.load %arg5[%c0_9, %c0_10] : memref<1x32xf32, #tpu.memory_space<vmem>>, vector<1x32xf32>
    %15 = vector.broadcast %14 : vector<1x32xf32> to vector<8x32xf32>
    %16 = arith.addf %13, %15 : vector<8x32xf32>
    %cst_11 = arith.constant 0.000000e+00 : f32
    %17 = vector.broadcast %cst_11 : f32 to vector<8x32xf32>
    %18 = arith.maximumf %16, %17 : vector<8x32xf32>
    %19 = vector.extract_strided_slice %18 {offsets = [0, 0], sizes = [8, 16], strides = [1, 1]} : vector<8x32xf32> to vector<8x16xf32>
    %20 = vector.extract_strided_slice %18 {offsets = [0, 16], sizes = [8, 16], strides = [1, 1]} : vector<8x32xf32> to vector<8x16xf32>
    %21 = arith.maximumf %19, %20 : vector<8x16xf32>
    %c0_12 = arith.constant 0 : index
    %c0_13 = arith.constant 0 : index
    %22 = vector.load %arg6[%c0_12, %c0_13] : memref<16x32xf32, #tpu.memory_space<vmem>>, vector<16x32xf32>
    %cst_14 = arith.constant dense<0.000000e+00> : vector<8x32xf32>
    %23 = tpu.matmul %21, %22, %cst_14 {dimension_numbers = #tpu.dot_dimension_numbers<[1], [0], [0], [1], [0, 0, 1, 1], [], []>} : vector<8x16xf32>, vector<16x32xf32>, vector<8x32xf32> -> vector<8x32xf32>
    %24 = vector.extract_strided_slice %0 {offsets = [0, 0], sizes = [8, 2], strides = [1, 1]} : vector<8x66xf32> to vector<8x2xf32>
    %c0_15 = arith.constant 0 : index
    %c0_16 = arith.constant 0 : index
    %25 = vector.load %arg7[%c0_15, %c0_16] : memref<2x32xf32, #tpu.memory_space<vmem>>, vector<2x32xf32>
    %cst_17 = arith.constant dense<0.000000e+00> : vector<8x32xf32>
    %26 = tpu.matmul %24, %25, %cst_17 {dimension_numbers = #tpu.dot_dimension_numbers<[1], [0], [0], [1], [0, 0, 1, 1], [], []>} : vector<8x2xf32>, vector<2x32xf32>, vector<8x32xf32> -> vector<8x32xf32>
    %27 = arith.addf %23, %26 : vector<8x32xf32>
    %c0_18 = arith.constant 0 : index
    %c0_19 = arith.constant 0 : index
    %28 = vector.load %arg8[%c0_18, %c0_19] : memref<1x32xf32, #tpu.memory_space<vmem>>, vector<1x32xf32>
    %29 = vector.broadcast %28 : vector<1x32xf32> to vector<8x32xf32>
    %30 = arith.addf %27, %29 : vector<8x32xf32>
    %cst_20 = arith.constant 0.000000e+00 : f32
    %31 = vector.broadcast %cst_20 : f32 to vector<8x32xf32>
    %32 = arith.maximumf %30, %31 : vector<8x32xf32>
    %c0_21 = arith.constant 0 : index
    %c0_22 = arith.constant 0 : index
    %33 = vector.load %arg9[%c0_21, %c0_22] : memref<32x32xf32, #tpu.memory_space<vmem>>, vector<32x32xf32>
    %cst_23 = arith.constant dense<0.000000e+00> : vector<8x32xf32>
    %34 = tpu.matmul %32, %33, %cst_23 {dimension_numbers = #tpu.dot_dimension_numbers<[1], [0], [0], [1], [0, 0, 1, 1], [], []>} : vector<8x32xf32>, vector<32x32xf32>, vector<8x32xf32> -> vector<8x32xf32>
    %c0_24 = arith.constant 0 : index
    %c0_25 = arith.constant 0 : index
    %35 = vector.load %arg10[%c0_24, %c0_25] : memref<1x32xf32, #tpu.memory_space<vmem>>, vector<1x32xf32>
    %36 = vector.broadcast %35 : vector<1x32xf32> to vector<8x32xf32>
    %37 = arith.addf %34, %36 : vector<8x32xf32>
    %cst_26 = arith.constant 0.000000e+00 : f32
    %38 = vector.broadcast %cst_26 : f32 to vector<8x32xf32>
    %39 = arith.maximumf %37, %38 : vector<8x32xf32>
    %c0_27 = arith.constant 0 : index
    %c0_28 = arith.constant 0 : index
    %40 = vector.load %arg11[%c0_27, %c0_28] : memref<8x32xf32, #tpu.memory_space<vmem>>, vector<8x32xf32>
    tpu.vector_store %arg11[%c0_27, %c0_28], %39 {strides = array<i32>} : memref<8x32xf32, #tpu.memory_space<vmem>>, vector<8x32xf32>,
    return
  }
  func.func @transform_0(%arg0: i32) -> (i32, i32) {
    %c0_i32 = arith.constant 0 : i32
    %c0_i32_0 = arith.constant 0 : i32
    return %arg0, %c0_i32 : i32, i32
  }
  func.func @transform_1(%arg0: i32) -> (i32, i32) {
    %c0_i32 = arith.constant 0 : i32
    %c0_i32_0 = arith.constant 0 : i32
    %c0_i32_1 = arith.constant 0 : i32
    return %c0_i32, %c0_i32_0 : i32, i32
  }
  func.func @transform_2(%arg0: i32) -> (i32, i32) {
    %c0_i32 = arith.constant 0 : i32
    %c0_i32_0 = arith.constant 0 : i32
    %c0_i32_1 = arith.constant 0 : i32
    return %c0_i32, %c0_i32_0 : i32, i32
  }
  func.func @transform_3(%arg0: i32) -> (i32, i32) {
    %c0_i32 = arith.constant 0 : i32
    %c0_i32_0 = arith.constant 0 : i32
    %c0_i32_1 = arith.constant 0 : i32
    return %c0_i32, %c0_i32_0 : i32, i32
  }
  func.func @transform_4(%arg0: i32) -> (i32, i32) {
    %c0_i32 = arith.constant 0 : i32
    %c0_i32_0 = arith.constant 0 : i32
    %c0_i32_1 = arith.constant 0 : i32
    return %c0_i32, %c0_i32_0 : i32, i32
  }
  func.func @transform_5(%arg0: i32) -> (i32, i32) {
    %c0_i32 = arith.constant 0 : i32
    %c0_i32_0 = arith.constant 0 : i32
    %c0_i32_1 = arith.constant 0 : i32
    return %c0_i32, %c0_i32_0 : i32, i32
  }
  func.func @transform_6(%arg0: i32) -> (i32, i32) {
    %c0_i32 = arith.constant 0 : i32
    %c0_i32_0 = arith.constant 0 : i32
    %c0_i32_1 = arith.constant 0 : i32
    return %c0_i32, %c0_i32_0 : i32, i32
  }
  func.func @transform_7(%arg0: i32) -> (i32, i32) {
    %c0_i32 = arith.constant 0 : i32
    %c0_i32_0 = arith.constant 0 : i32
    %c0_i32_1 = arith.constant 0 : i32
    return %c0_i32, %c0_i32_0 : i32, i32
  }
  func.func @transform_8(%arg0: i32) -> (i32, i32) {
    %c0_i32 = arith.constant 0 : i32
    %c0_i32_0 = arith.constant 0 : i32
    %c0_i32_1 = arith.constant 0 : i32
    return %c0_i32, %c0_i32_0 : i32, i32
  }
  func.func @transform_9(%arg0: i32) -> (i32, i32) {
    %c0_i32 = arith.constant 0 : i32
    %c0_i32_0 = arith.constant 0 : i32
    %c0_i32_1 = arith.constant 0 : i32
    return %c0_i32, %c0_i32_0 : i32, i32
  }
  func.func @transform_10(%arg0: i32) -> (i32, i32) {
    %c0_i32 = arith.constant 0 : i32
    %c0_i32_0 = arith.constant 0 : i32
    return %arg0, %c0_i32 : i32, i32
  }
}

</mosaic_0001>

<bundles_post_ra>
// kernel: tpu_custom_call.1
= control target key start
LH: loop header
LB: loop body
LE: loop exit
PB: predicated region body
PF: predicated region fallthrough
CT: control target
= control target key end

     0   :  { %s1321_s0 = inlined_call_operand.vmem [shape: f32[16,66], index: 0, kind: input, shape index: {}]   ;;  %s1322_s1 = inlined_call_operand.vmem [shape: f32[64,56], index: 1, kind: input, shape index: {}]   ;;  %s1323_s2 = inlined_call_operand.vmem [shape: f32[1,56], index: 2, kind: input, shape index: {}]   ;;  %s1324_s3 = inlined_call_operand.vmem [shape: f32[28,32], index: 3, kind: input, shape index: {}]   ;;  %s1325_s4 = inlined_call_operand.vmem [shape: f32[1,32], index: 4, kind: input, shape index: {}]   ;;  %s1326_s5 = inlined_call_operand.vmem [shape: f32[16,32], index: 5, kind: input, shape index: {}]   ;;  %s1327_s6 = inlined_call_operand.vmem [shape: f32[2,32], index: 6, kind: input, shape index: {}]   ;;  %s1328_s7 = inlined_call_operand.vmem [shape: f32[1,32], index: 7, kind: input, shape index: {}]   ;;  %s1329_s8 = inlined_call_operand.vmem [shape: f32[32,32], index: 8, kind: input, shape index: {}]   ;;  %s1330_s9 = inlined_call_operand.vmem [shape: f32[1,32], index: 9, kind: input, shape index: {}]   ;;  %s1331_s10 = inlined_call_operand.hbm [shape: f32[16,32], index: 10, kind: output, shape index: {}]  }
   0x1   :  { %1332 = sst [smem:[#allocation5_spill]] %s1321_s0 }
   0x2   :  { %15 = vsyncpa [#allocation3], 0 }
   0x3   :  { %17 = vsyncpa [#allocation3 + $0x1], 0  ;;  %s1136_s13 = smov 0   ;;  %s1138_s14 = smov 0  }
   0x4   :  { %s1140_s15 = smov 0   ;;  %s1142_s16 = smov 0  }
   0x5 LB: > { %s1157_s17 = sadd.s32 4294967295, %s1073_s16   ;;  %s871_s18 = sadd.s32 4294967294, %s1073_s16   ;;  %s1073_s16 = sphi %s1142_s16, %s1339_s16   ;;  %s1069_s15 = sphi %s1140_s15, %s1338_s15   ;;  %s1065_s14 = sphi %s1138_s14, %s1337_s14   ;;  %s1061_s13 = sphi %s1136_s13, %s1336_s13  }
   0x6   : > { %s1161_s19 = sadd.s32 1, %s1073_s16   ;;  %s245_s20 = sadd.s32 1, %s1069_s15 }
   0x7   : > { %s242_s21 = ssub.s32 %s1073_s16, %s1161_s19  ;;  %p255_p0 = scmp.ne.s32.totalorder %s1069_s15, %s1065_s14 }
   0x8   : > { %p243_p1 = scmp.eq.s32.totalorder %s242_s21, 0  ;;  %p256_p2 = scmp.eq.s32.totalorder %s1157_s17, 1 }
   0x9   : > { %p261_p3 = scmp.ne.s32.totalorder %s1065_s14, %s1061_s13  ;;  %p262_p4 = scmp.eq.s32.totalorder %s871_s18, 1 }
   0xa   : > { %s1172_s22 = scalar_select %p243_p1, %s1069_s15, %s245_s20  }
   0xb   : > { %p1174_p5 = por %p256_p2, %p255_p0  ;;  %p1178_p6 = por %p262_p4, %p261_p3 }
   0xc   : > { %p874_p7 = scmp.ge.s32.totalorder %s1073_s16, 1  ;;  %p314_p8 = scmp.lt.s32.totalorder %s1073_s16, 3 }
   0xe   : > { %p315_p9 = pnand %p874_p7, %p314_p8 }
   0xf   : > { %p351_p10 = scmp.lt.s32.totalorder (!%p315_p9), %s1157_s17, 1  ;;  %s1335_s0 = sld [smem:[#allocation5_spill]] (!%p315_p9) }
  0x10   : > { %318 = sbr.rel (%p315_p9) target bundleno = 1178 (0x49a), region = 60  ;;  %s1077_s27 = smov (!%p315_p9), 126  }
  0x11   : > { %s1079_s18 = smov (!%p315_p9), 112   ;;  %s889_s26 = sshll.u32 (!%p315_p9), %s1157_s17, 7 }
  0x12   : > { %s810_s11 = scalar_lea.hbm (!%p315_p9), %s1331_s10, %s889_s26 }
  0x15   : > { %v363_v0 = vld [vmem:[%s1322_s1 + $0x38] sm:$0xff]  ;;  %v1075_v1 = vmov 0.0   ;;  %v362_v2 = vld [vmem:[%s1322_s1 + $0x30] sm:$0xff]  ;;  %s352_s29 = scalar_select %p351_p10, %s1157_s17, 1  ;;  %vm1076_vm0 = vmmov 0   ;;  %v361_v3 = vld [vmem:[%s1322_s1 + $0x28] sm:$0xff] }
  0x16   : > { %916 = vmatprep.subr.mxu0 %v1075_v1  ;;  %935 = vmatprep.subr.mxu1 %v1075_v1  ;;  %v360_v4 = vld [vmem:[%s1322_s1 + $0x20] sm:$0xff]  ;;  %v359_v6 = vld [vmem:[%s1322_s1 + $0x18] sm:$0xff]  ;;  %v358_v7 = vld [vmem:[%s1322_s1 + $0x10] sm:$0xff]  ;;  %vm374_vm1 = vcmask 523264   ;;  %vm468_vm2 = vcmask 1043456   ;;  %vm464_vm3 = vcmask 228352  }
  0x17   : > { %917 = vmatpush3.msra.mxu0 %v363_v0  ;;  %932 = vmatprep.mubr.msk.f32.mxu0 %vm1076_vm0, %v1075_v1  ;;  %s876_s12 = sshll.u32 %s352_s29, 3  ;;  %v357_v8 = vld [vmem:[%s1322_s1 + $0x8] sm:$0xff]  ;;  %v356_v9 = vld [vmem:[%s1322_s1] sm:$0xff]  ;;  %v456_v11 = vld [vmem:[%s1324_s3 + $0x18] sm:$0xf]  ;;  %vm554_vm4 = vcmask 1041408  }
  0x18   : > { %918 = vmatprep.subr.mxu0 %v1075_v1  ;;  %943 = vmatprep.mubr.msk.f32.mxu1 %vm1076_vm0, %v1075_v1  ;;  %s354_s21 = scalar_lea.vmem %s1335_s0, %s876_s12  ;;  %v455_v12 = vld [vmem:[%s1324_s3 + $0x10] sm:$0xff]  ;;  %v454_v13 = vld [vmem:[%s1324_s3 + $0x8] sm:$0xff]  ;;  %v453_v14 = vld [vmem:[%s1324_s3] sm:$0xff]  ;;  %vm551_vm5 = vcmask 15360   ;;  %vm628_vm6 = vcmask 130048   ;;  %vm722_vm7 = vcmask 261120  }
  0x19   : > { %919 = vmatpush3.msra.mxu0 %v362_v2  ;;  %v355_v5 = vld [vmem:[%s354_s21] sm:$0xff]  ;;  %936 = vmatpush3.msk.msra.mxu1 %vm468_vm2, %v456_v11  ;;  %s1078_s21 = smov 100   ;;  %v549_v23 = vld [vmem:[%s1326_s5 + $0x8] sm:$0xff]  ;;  %v714_v34 = vld [vmem:[%s1329_s8 + $0x18] sm:$0xff] }
  0x1a   : > { %920 = vmatprep.subr.mxu0 %v1075_v1  ;;  %372 = vrot.lane.b32.xlu0 %v355_v5, %s1077_s27  ;;  %v877_v15 = vld [vmem:[%s1323_s2] ss:$0 sm:$0xff]  ;;  %v713_v35 = vld [vmem:[%s1329_s8 + $0x10] sm:$0xff]  ;;  %v712_v36 = vld [vmem:[%s1329_s8 + $0x8] sm:$0xff] }
  0x1b   : > { %921 = vmatpush3.msra.mxu0 %v361_v3  ;;  %937 = vmatprep.subr.mxu1 %v1075_v1  ;;  %v550_v22 = vld [vmem:[%s1327_s6] sm:$0x3] }
  0x1c   : > { %922 = vmatprep.subr.mxu0 %v1075_v1  ;;  %938 = vmatpush3.msra.mxu1 %v455_v12  ;;  %v548_v24 = vld [vmem:[%s1326_s5] sm:$0xff] }
  0x1d   : > { %923 = vmatpush3.msra.mxu0 %v360_v4  ;;  %939 = vmatprep.subr.mxu1 %v1075_v1  ;;  %v879_v25 = vld [vmem:[%s1325_s4] ss:$0 sm:$0xff] }
  0x1e   : > { %924 = vmatprep.subr.mxu0 %v1075_v1  ;;  %940 = vmatpush3.msra.mxu1 %v454_v13  ;;  %v711_v37 = vld [vmem:[%s1329_s8] sm:$0xff] }
  0x1f   : > { %925 = vmatpush3.msra.mxu0 %v359_v6  ;;  %941 = vmatprep.subr.mxu1 %v1075_v1  ;;  %v885_v39 = vld [vmem:[%s1328_s7] ss:$0 sm:$0xff] }
  0x20   : > { %926 = vmatprep.subr.mxu0 %v1075_v1  ;;  %942 = vmatpush3.msra.mxu1 %v453_v14  ;;  %v886_v44 = vld [vmem:[%s1330_s9] ss:$0 sm:$0xff] }
  0x21   : > { %927 = vmatpush3.msra.mxu0 %v358_v7  ;;  %946 = vmatprep.subr.mxu1 %v1075_v1 }
  0x22   : > { %928 = vmatprep.subr.mxu0 %v1075_v1 }
  0x23   : > { %929 = vmatpush3.msra.mxu0 %v357_v8 }
  0x24   : > { %930 = vmatprep.subr.mxu0 %v1075_v1 }
  0x25   : > { %931 = vmatpush3.msra.mxu0 %v356_v9 }
  0x26   : > { %958 = vmatprep.subr.mxu0 %v1075_v1 }
  0x8c   : > { %v373_v10 = vpop.permute.xlu0 %372 }
  0x8d   : > { %933 = vmatmul.mubr.msk.f32.vlgmr.msra.gmra.mxu0 %vm374_vm1, %v373_v10 }
  0x8e   : > { %966 = vmatprep.mubr.msk.f32.mxu0 %vm1076_vm0, %v1075_v1  ;;  %959 = vmatpush3.msra.mxu0 %v714_v34 }
  0x8f   : > { %960 = vmatprep.subr.mxu0 %v1075_v1 }
  0x90   : > { %961 = vmatpush3.msra.mxu0 %v713_v35 }
  0x91   : > { %962 = vmatprep.subr.mxu0 %v1075_v1 }
  0x92   : > { %963 = vmatpush3.msra.mxu0 %v712_v36 }
  0x93   : > { %964 = vmatprep.subr.mxu0 %v1075_v1 }
  0x94   : > { %965 = vmatpush3.msra.mxu0 %v711_v37 }
 0x14d   : > { %v443_v16 = vpop.f32.mrf.mxu0 }
 0x14e   : > { %v444_v17 = vadd.f32 %v877_v15, %v443_v16 }
 0x14f   : > { %v934_v18 = vpop.f32.mrf.mxu0 }
 0x150   : > { %v447_v19 = vmax.f32 %v444_v17, 0.0 }
 0x152   : > { %449 = vrot.lane.b32.xlu0 %v447_v19, %s1078_s21  ;;  %s1080_s21 = smov [#allocation2]  }
 0x153   : > { %s1017_s25 = sshll.u32 %s1080_s21, 4  ;;  %s1018_s25 = int_to_ptr.vmem [resolvable:$false] %s1017_s25 }
 0x154   : > { %s1019_s17 = scalar_lea.vmem %s1018_s25, 256 }
 0x1c4   : > { %v450_v20 = vpop.permute.xlu0 %449 }
 0x1c5   : > { %v452_v21 = vmax.f32 %v447_v19, %v450_v20 }
 0x1c7   : > { %944 = vmatmul.mubr.msk.f32.vlgmr.msra.gmra.mxu1 %vm464_vm3, %v452_v21 }
 0x1c8   : > { %948 = vmatprep.mubr.msk.f32.mxu1 %vm1076_vm0, %v1075_v1  ;;  %947 = vmatpush3.msk.msra.mxu1 %vm554_vm4, %v550_v22 }
 0x1c9   : > { %951 = vmatprep.subr.mxu1 %v1075_v1 }
 0x1cb   : > { %949 = vmatmul.mubr.msk.f32.vlgmr.msra.gmra.mxu1 %vm551_vm5, %v355_v5 }
 0x1cc   : > { %952 = vmatpush3.msra.mxu1 %v549_v23  ;;  %955 = vmatprep.mubr.msk.f32.mxu1 %vm1076_vm0, %v1075_v1 }
 0x1cd   : > { %953 = vmatprep.subr.mxu1 %v1075_v1 }
 0x1ce   : > { %954 = vmatpush3.msra.mxu1 %v548_v24 }
 0x287   : > { %v538_v26 = vpop.f32.mrf.mxu1 }
 0x288   : > { %v539_v27 = vadd.f32 %v879_v25, %v538_v26 }
 0x289   : > { %v945_v28 = vpop.f32.mrf.mxu1 }
 0x28a   : > { %v542_v29 = vmax.f32 %v539_v27, 0.0 }
 0x28b   : > { %v624_v30 = vpop.f32.mrf.mxu1 }
 0x28c   : > { %544 = vrot.lane.b32.xlu1 %v542_v29, %s1079_s18  ;;  %s348_s18 = sand.u32 1, %s1065_s14  }
 0x28d   : > { %v950_v31 = vpop.f32.mrf.mxu1  ;;  %s875_s20 = sshll.u32 %s348_s18, 3  ;;  %s799_s12 = scalar_lea.sflag [#allocation3], %s348_s18 }
 0x28e   : > { %s350_s27 = scalar_lea.vmem [#allocation2], %s875_s20 }
 0x28f   : > { %s812_s28 = sshll.u32 %s350_s27, 4  ;;  %s813_s28 = int_to_ptr.vmem [resolvable:$true] %s812_s28 }
 0x290   : > { %s1013_s0 = scalar_lea.vmem %s813_s28, 128  ;;  %p1020_p0 = scmp.lt.s32.totalorder %s813_s28, %s1018_s25 }
 0x291   : > { %p1014_p11 = scmp.ne.s32.totalorder %s813_s28, %s1013_s0  ;;  %p1021_p1 = scmp.lt.s32.totalorder %s1019_s17, %s1013_s0 }
 0x293   : > { %p1015_p12 = pnand %p1014_p11, %p1174_p5  ;;  %p1022_p2 = por %p1021_p1, %p1020_p0 }
 0x295   : > { %p1016_p13 = pneg %p1015_p12 }
 0x297   : > { %p1023_p3 = pnand %p1022_p2, %p1016_p13 }
 0x2fe   : > { %v545_v32 = vpop.permute.xlu1 %544 }
 0x2ff   : > { %v547_v33 = vmax.f32 %v542_v29, %v545_v32 }
 0x301   : > { %956 = vmatmul.mubr.msk.f32.vlgmr.msra.gmra.mxu1 %vm628_vm6, %v547_v33 }
 0x3c1   : > { %v698_v38 = vpop.f32.mrf.mxu1 }
 0x3c2   : > { %v699_v40 = vadd.f32 %v698_v38, %v624_v30 }
 0x3c3   : > { %v957_v41 = vpop.f32.mrf.mxu1 }
 0x3c4   : > { %v709_v42 = vadd.f32 %v885_v39, %v699_v40 }
 0x3c6   : > { %v710_v43 = vmax.f32 %v709_v42, 0.0 }
 0x3c8   : > { %967 = vmatmul.mubr.msk.f32.vlgmr.msra.gmra.mxu0 %vm722_vm7, %v710_v43 }
 0x488   : > { %v792_v45 = vpop.f32.mrf.mxu0 }
 0x489   : > { %v793_v46 = vadd.f32 %v886_v44, %v792_v45 }
 0x48a   : > { %v968_v47 = vpop.f32.mrf.mxu0 }
 0x48b   : > { %v796_v48 = vmax.f32 %v793_v46, 0.0 }
 0x48d   : > { %797 = vst.msk [vmem:[%s350_s27] sm:$0xff] %vm722_vm7, %v796_v48 }
 0x48e   : > { %1026 = shalt.err (!%p1023_p3)
}
 0x48f   : > { %s1027_s20 = scalar_lea.hbm %s810_s11, 128  ;;  %s1031_s27 = scalar_lea.hbm %s1331_s10, 256 }
 0x490   : > { %p1028_p4 = scmp.ne.s32.totalorder %s810_s11, %s1027_s20  ;;  %p1032_p9 = scmp.lt.s32.totalorder %s810_s11, %s1331_s10 }
 0x491   : > { %p1033_p10 = scmp.lt.s32.totalorder %s1031_s27, %s1027_s20 }
 0x492   : > { %p1029_p7 = pnand %p1028_p4, %p1174_p5 }
 0x493   : > { %p1034_p11 = por %p1033_p10, %p1032_p9 }
 0x494   : > { %p1030_p8 = pneg %p1029_p7 }
 0x496   : > { %p1035_p12 = pnand %p1034_p11, %p1030_p8 }
 0x498   : > { %1038 = shalt.err (!%p1035_p12)
}
 0x499   : > { %969 = dma.vmem_to_hbm [thread:$0]  (%p1174_p5), %s813_s28, 128, %s810_s11, %s799_s12  }
 0x49a PF: > { %p975_p13 = scmp.ge.s32.totalorder %s1073_s16, 2  ;;  %s824_s0 = sand.u32 1, %s1061_s13  }
 0x49b   : > { %s825_s21 = scalar_lea.sflag [#allocation3], %s824_s0 }
 0x49c   : > { %p972_p0 = pnand %p975_p13, %p1178_p6 }
 0x49e   : > { %p973_p1 = pneg %p972_p0 }
 0x4a0   : > { %1056 = dma.done.wait (%p973_p1), %s825_s21, 128  }
 0x4a1   : > { %1058 = vsyncadd (%p973_p1), %s825_s21, 4294967168  ;;  %p20_p2 = scmp.ge.s32.totalorder %s1161_s19, 4   ;;  %s1336_s13 = smov %s1065_s14 }
 0x4a2   : > { %s1337_s14 = smov %s1069_s15  ;;  %s1338_s15 = smov %s1172_s22 }
 0x4a3   : > { %s1339_s16 = smov %s1161_s19  ;;  %22 = sbr.rel (!%p20_p2) target bundleno = 5 (0x5), region = 95 }
 0x4a8   :  { %830 = vsyncpa [#allocation3], 1 }
 0x4a9   :  { %832 = vsyncpa [#allocation3 + $0x1], 1 }

</bundles_post_ra>
